<compile_context>
chip_gen: v7x
topology: tpu7x:2x2x1
jax: 0.10.0
libtpu: 0.0.40
codegen_flags: <defaults>
</compile_context>

<pallas_src>
import numpy as np
import jax
import jax.numpy as jnp
from jax import lax
from jax.experimental import pallas as pl
from jax.experimental.pallas import tpu as pltpu


_LN_EPS = 1e-5  # nn.LayerNorm default


# ----------------------------------------------------------------------------
# Duration VariancePredictor: tiled over flattened (B*L, C), masks built in-kernel
# ----------------------------------------------------------------------------
def _make_dur_kernel(L):
    def kernel(x_ref, w1_ref, w2_ref, vec_ref, out_ref):
        x = x_ref[...]                                  # (TM, C), TM = items_per_tile * L
        TM = x.shape[0]
        vec = vec_ref[...]                              # (8, C) packed small params
        b1, g1, be1 = vec[0:1], vec[1:2], vec[2:3]
        b2, g2, be2 = vec[3:4], vec[4:5], vec[5:6]
        lw, lbC = vec[6:7], vec[7:8]                    # lbC = lin_bias / C (broadcast row)

        # Batch-item boundary masks from an iota (tile always holds whole items).
        row = lax.broadcasted_iota(jnp.int32, (TM, 1), 0)
        pos = (row & (L - 1)) if (L & (L - 1)) == 0 else (row % L)
        mp = (pos != 0).astype(jnp.float32)             # 0 at first row of each item
        mn = (pos != (L - 1)).astype(jnp.float32)       # 0 at last  row of each item

        def shifts(h):
            zero = jnp.zeros((1, h.shape[1]), h.dtype)
            hp = jnp.concatenate([zero, h[:-1]], axis=0) * mp
            hn = jnp.concatenate([h[1:], zero], axis=0) * mn
            return hp, hn

        def ln(h, g, b):
            mu = jnp.mean(h, axis=-1, keepdims=True)
            var = jnp.mean((h - mu) ** 2, axis=-1, keepdims=True)
            return (h - mu) * lax.rsqrt(var + _LN_EPS) * g + b

        # conv1 (kernel_size=3, padding=1) as a single (TM, 3C) @ (3C, C) matmul
        hp, hn = shifts(x)
        h = jnp.dot(jnp.concatenate([hp, x, hn], axis=-1), w1_ref[...],
                    preferred_element_type=jnp.float32) + b1
        h = ln(jnp.maximum(h, 0.0), g1, be1)
        hp, hn = shifts(h)
        h = jnp.dot(jnp.concatenate([hp, h, hn], axis=-1), w2_ref[...],
                    preferred_element_type=jnp.float32) + b2
        h = ln(jnp.maximum(h, 0.0), g2, be2)
        # N=1 projection off the MXU: VPU multiply + lane reduction (sum(lbC) == lin_bias)
        o = jnp.sum(h * lw + lbC, axis=-1, keepdims=True)
        out_ref[...] = jnp.maximum(o, 0.0)              # reference applies ReLU after Linear
    return kernel


def _items_per_tile(B, L, target_rows=256):
    """Whole-batch-item tiles (so conv halos never cross tiles), sublane-aligned."""
    cands = [d for d in range(1, B + 1) if B % d == 0 and ((d * L) % 8 == 0 or d == B)]
    good = [d for d in cands if d * L <= target_rows]
    return max(good) if good else min(cands)


def variance_predictor_duration(x, params, *, target_rows=256):
    """x: (B, L, C) -> (B, L) log-duration prediction."""
    B, L, C = x.shape
    bt = _items_per_tile(B, L, target_rows)
    TM = bt * L
    M = B * L
    out = pl.pallas_call(
        _make_dur_kernel(L),
        out_shape=jax.ShapeDtypeStruct((M, 1), jnp.float32),
        grid=(M // TM,),
        in_specs=[
            pl.BlockSpec((TM, C), lambda i: (i, 0)),
            pl.BlockSpec((3 * C, C), lambda i: (0, 0)),     # resident weights
            pl.BlockSpec((3 * C, C), lambda i: (0, 0)),
            pl.BlockSpec((8, C), lambda i: (0, 0)),
        ],
        out_specs=pl.BlockSpec((TM, 1), lambda i: (i, 0)),
        compiler_params=pltpu.CompilerParams(dimension_semantics=("parallel",)),
    )(x.reshape(M, C), params["w1"], params["w2"], params["vec"])
    return out.reshape(B, L)


# ----------------------------------------------------------------------------
# Fused: length-regulate gather + stacked pitch/energy VP + bucketize/embed + residual
# ----------------------------------------------------------------------------
def _make_fused_kernel(L, Lmel, C, n_bins, pitch_control, energy_control):
    ctls = (float(pitch_control), float(energy_control))

    def kernel(x_ref, idx_ref, w1_ref, w2_ref, vec_ref, buck_ref, table_ref,
               out_ref, logit_ref):
        x = x_ref[0]                                    # (L, C) un-expanded input, batch b
        idx = idx_ref[0]                                # (Lmel_c, 1) int32; -1 == padding row
        Lmel_c = idx.shape[0]
        vec = vec_ref[...]                              # (8, 2C) packed small params
        b1, g1, be1 = vec[0:1], vec[1:2], vec[2:3]
        b2, g2, be2 = vec[3:4], vec[4:5], vec[5:6]
        lw, lbC = vec[6:7], vec[7:8]
        buck = buck_ref[...]                            # (2, n_bins)

        # --- LengthRegulator: gather rows of x via one-hot built from the index column
        # (L is small here; at large L a DMA row-gather via scalar prefetch would win). ---
        lane_L = lax.broadcasted_iota(jnp.int32, (Lmel_c, L), 1)
        onehot = (lane_L == idx).astype(jnp.float32)    # idx == -1 -> all-zero row
        x_exp = jnp.dot(onehot, x, preferred_element_type=jnp.float32)   # (Lmel_c, C)

        row = lax.broadcasted_iota(jnp.int32, (Lmel_c, 1), 0)
        valid = (row < Lmel).astype(jnp.float32)        # rows >= Lmel: 8-row alignment pad

        # Per-head lane masks: lanes [0, C) = pitch head, lanes [C, 2C) = energy head.
        lane2 = lax.broadcasted_iota(jnp.int32, (1, 2 * C), 1)
        m0 = (lane2 < C).astype(jnp.float32)
        m1 = 1.0 - m0
        inv_c = 1.0 / C

        def ln_two_heads(h, g, b):
            s0 = jnp.sum(h * m0, axis=-1, keepdims=True) * inv_c
            s1 = jnp.sum(h * m1, axis=-1, keepdims=True) * inv_c
            d = h - (s0 * m0 + s1 * m1)
            v0 = jnp.sum(d * d * m0, axis=-1, keepdims=True) * inv_c
            v1 = jnp.sum(d * d * m1, axis=-1, keepdims=True) * inv_c
            return d * lax.rsqrt(v0 * m0 + v1 * m1 + _LN_EPS) * g + b

        def shifts(h):
            zero = jnp.zeros((1, h.shape[1]), h.dtype)
            return (jnp.concatenate([zero, h[:-1]], axis=0),
                    jnp.concatenate([h[1:], zero], axis=0))

        # Layer 1: both heads read the shared x_exp -> dense (3C, 2C) weight, N = 2C lanes.
        xp, xn = shifts(x_exp)
        h = jnp.dot(jnp.concatenate([xp, x_exp, xn], axis=-1), w1_ref[...],
                    preferred_element_type=jnp.float32) + b1
        h = ln_two_heads(jnp.maximum(h, 0.0), g1, be1)
        h = h * valid                                   # pad rows act like conv zero-padding
        # Layer 2: heads are independent -> block-diagonal (6C, 2C) weight, still N = 2C.
        hp, hn = shifts(h)
        h = jnp.dot(jnp.concatenate([hp, h, hn], axis=-1), w2_ref[...],
                    preferred_element_type=jnp.float32) + b2
        h = ln_two_heads(jnp.maximum(h, 0.0), g2, be2)

        # Final N=1 projections off the MXU: VPU multiply + masked lane reductions.
        logit_wide = h * lw + lbC                       # lbC = lin_bias / C per head
        lp = jnp.maximum(jnp.sum(logit_wide * m0, axis=-1, keepdims=True), 0.0)
        le = jnp.maximum(jnp.sum(logit_wide * m1, axis=-1, keepdims=True), 0.0)

        def bucket_onehot(logv, head):
            # torch.bucketize(right=False) == count of boundaries strictly < v
            v = jnp.log((jnp.exp(logv) - 1.0) * ctls[head] + 1.0)
            b = buck[head:head + 1, :]                  # (1, n_bins)
            bidx = jnp.sum((b < v).astype(jnp.int32), axis=-1, keepdims=True)
            # TODO(synk): torch.bucketize can return n_bins and nn.Embedding would then
            # raise an index error; we clamp to the last bucket instead.
            bidx = jnp.minimum(bidx, n_bins - 1)
            it = lax.broadcasted_iota(jnp.int32, (Lmel_c, n_bins), 1)
            return (it == bidx).astype(jnp.float32)     # (Lmel_c, n_bins)

        # Both embedding lookups packed into one (Lmel_c, 2*n_bins) @ (2*n_bins, C) matmul.
        oh = jnp.concatenate([bucket_onehot(lp, 0), bucket_onehot(le, 1)], axis=-1)
        emb = jnp.dot(oh, table_ref[...], preferred_element_type=jnp.float32)    # (Lmel_c, C)

        out_ref[0] = x_exp + emb
        logit_ref[0] = jnp.concatenate([lp, le], axis=-1)   # (Lmel_c, 2): [log_pitch | log_energy]
    return kernel


def fused_expand_predict_embed(x, idx3, pe, Lmel, pitch_control, energy_control):
    B, L, C = x.shape
    Lmel_c = idx3.shape[1]
    n_bins = pe["buckets"].shape[-1]
    kernel = _make_fused_kernel(L, Lmel, C, n_bins, pitch_control, energy_control)

    const2 = lambda shape: pl.BlockSpec(shape, lambda b: (0, 0))     # resident across grid

    out_shape = (jax.ShapeDtypeStruct((B, Lmel_c, C), jnp.float32),
                 jax.ShapeDtypeStruct((B, Lmel_c, 2), jnp.float32))
    return pl.pallas_call(
        kernel,
        out_shape=out_shape,
        grid=(B,),
        in_specs=[
            pl.BlockSpec((1, L, C), lambda b: (b, 0, 0)),
            pl.BlockSpec((1, Lmel_c, 1), lambda b: (b, 0, 0)),
            const2((3 * C, 2 * C)),
            const2((6 * C, 2 * C)),
            const2((8, 2 * C)),
            const2((2, n_bins)),
            const2((2 * n_bins, C)),
        ],
        out_specs=[pl.BlockSpec((1, Lmel_c, C), lambda b: (b, 0, 0)),
                   pl.BlockSpec((1, Lmel_c, 2), lambda b: (b, 0, 0))],
        compiler_params=pltpu.CompilerParams(dimension_semantics=("parallel",)),
    )(x, idx3, pe["w1"], pe["w2"], pe["vec"], pe["buckets"], pe["table"])


# ----------------------------------------------------------------------------
# Parameter construction / repacking (mirrors the PyTorch module's layers)
# ----------------------------------------------------------------------------
def init_variance_predictor(key, C, lin_bias=0.0, scale=0.1):
    ks = jax.random.split(key, 3)
    return {
        "conv1_w": jax.random.normal(ks[0], (C, C, 3), jnp.float32) * scale,
        "conv1_b": jnp.zeros((C,), jnp.float32),
        "ln1_g": jnp.ones((C,), jnp.float32), "ln1_b": jnp.zeros((C,), jnp.float32),
        "conv2_w": jax.random.normal(ks[1], (C, C, 3), jnp.float32) * scale,
        "conv2_b": jnp.zeros((C,), jnp.float32),
        "ln2_g": jnp.ones((C,), jnp.float32), "ln2_b": jnp.zeros((C,), jnp.float32),
        "lin_w": jax.random.normal(ks[2], (1, C), jnp.float32) * scale,
        "lin_b": jnp.full((1,), lin_bias, jnp.float32),
    }


def _tap_cat(w, C):
    # Conv1d weight (C_out, C_in, 3) -> (3*C_in, C_out) so [h_prev|h|h_next] @ W == padding=1 conv
    return jnp.transpose(w, (2, 1, 0)).reshape(3 * C, C)


def _vec_rows(p, C):
    rows = [p["conv1_b"], p["ln1_g"], p["ln1_b"],
            p["conv2_b"], p["ln2_g"], p["ln2_b"],
            p["lin_w"].reshape(C), jnp.full((C,), p["lin_b"][0] / C, jnp.float32)]
    return jnp.stack(rows, axis=0)                      # (8, C)


def _prep_duration(p, C):
    return {"w1": _tap_cat(p["conv1_w"], C), "w2": _tap_cat(p["conv2_w"], C),
            "vec": _vec_rows(p, C)}


def _prep_pitch_energy(pp, ep, C, pitch_buckets, energy_buckets, pitch_table, energy_table):
    # conv1: shared input -> dense (3C, 2C)
    w1 = jnp.concatenate([_tap_cat(pp["conv1_w"], C), _tap_cat(ep["conv1_w"], C)], axis=1)
    # conv2: per-head inputs -> block-diagonal (6C, 2C); built once at init (host side).
    w2p = np.asarray(_tap_cat(pp["conv2_w"], C))
    w2e = np.asarray(_tap_cat(ep["conv2_w"], C))
    w2 = np.zeros((6 * C, 2 * C), np.float32)
    for t in range(3):
        w2[t * 2 * C:t * 2 * C + C, 0:C] = w2p[t * C:(t + 1) * C]
        w2[t * 2 * C + C:(t + 1) * 2 * C, C:2 * C] = w2e[t * C:(t + 1) * C]
    vec = jnp.concatenate([_vec_rows(pp, C), _vec_rows(ep, C)], axis=1)    # (8, 2C)
    return {"w1": w1, "w2": jnp.asarray(w2), "vec": vec,
            "buckets": jnp.stack([pitch_buckets, energy_buckets], axis=0),  # (2, n_bins)
            "table": jnp.concatenate([pitch_table, energy_table], axis=0)}  # (2*n_bins, C)


# ----------------------------------------------------------------------------
# VarianceAdaptor
# ----------------------------------------------------------------------------
class VarianceAdaptorPallas:
    def __init__(self, key, input_channels=64, n_bins=32, encoder_hidden=64,
                 pitch_min=60.0, pitch_max=600.0, energy_min=10.0, energy_max=150.0):
        # The residual add in the reference only type-checks when encoder_hidden == channels.
        assert encoder_hidden == input_channels
        C = input_channels
        self.C, self.n_bins = C, n_bins
        ks = jax.random.split(key, 5)
        # NOTE: the adaptor-level duration_predictor in the PyTorch module is never called
        # by forward(); only the LengthRegulator's duration predictor matters.
        self.dur = _prep_duration(init_variance_predictor(ks[0], C, lin_bias=1.0), C)
        pp = init_variance_predictor(ks[1], C, lin_bias=4.5)
        ep = init_variance_predictor(ks[2], C, lin_bias=3.0)
        pb = jnp.linspace(np.log(pitch_min), np.log(pitch_max), n_bins).astype(jnp.float32)
        eb = jnp.linspace(np.log(energy_min), np.log(energy_max), n_bins).astype(jnp.float32)
        pt = jax.random.normal(ks[3], (n_bins, encoder_hidden), jnp.float32) * 0.1
        et = jax.random.normal(ks[4], (n_bins, encoder_hidden), jnp.float32) * 0.1
        self.pe = _prep_pitch_energy(pp, ep, C, pb, eb, pt, et)

    def __call__(self, x, mel_max_length=None, duration_control=1.0,
                 pitch_control=1.0, energy_control=1.0):
        B, L, C = x.shape

        # --- duration predictor (tiled, parallel grid) ---
        log_dur = variance_predictor_duration(x, self.dur)                    # (B, L)

        # --- durations -> per-mel-frame source indices, built ON DEVICE ---
        # Reference: ((exp(log_d) - 1) * ctl).int()  (truncation toward zero), clamp >= 0.
        dur = jnp.maximum(((jnp.exp(log_dur) - 1.0) * duration_control).astype(jnp.int32), 0)
        cum = jnp.cumsum(dur, axis=1)                                          # (B, L)
        totals = cum[:, -1]                                                    # (B,)
        if mel_max_length is not None:
            # Static cap supplied by the caller -> no host sync at all.
            Lmel = int(mel_max_length)
        else:
            # Only this single scalar crosses to host (static output length is required);
            # the previous full-duration round trip + Python repeat loop is gone.
            Lmel = int(jax.device_get(jnp.max(totals)))
        Lmel = max(Lmel, 1)
        Lmel_c = -(-Lmel // 8) * 8                                             # sublane-align rows
        t = jnp.arange(Lmel_c, dtype=jnp.int32)
        # source index of mel frame t == number of cumulative boundaries <= t (== np.repeat)
        idx = jnp.sum((cum[:, None, :] <= t[None, :, None]).astype(jnp.int32), axis=-1)
        keep = t[None, :] < jnp.minimum(totals, Lmel)[:, None]
        idx3 = jnp.where(keep, idx, -1).astype(jnp.int32).reshape(B, Lmel_c, 1)

        # --- fused: gather (length regulate) + stacked pitch/energy VP + embed + residual ---
        out_c, logits_c = fused_expand_predict_embed(
            x, idx3, self.pe, Lmel, pitch_control, energy_control)
        out = out_c[:, :Lmel]
        log_pitch = logits_c[:, :Lmel, 0]
        log_energy = logits_c[:, :Lmel, 1]

        mel_pos = jnp.tile(jnp.arange(1, Lmel + 1, dtype=jnp.int32)[None, :], (B, 1))
        return out, log_pitch, log_energy, log_dur, mel_pos


if __name__ == "__main__":
    key = jax.random.PRNGKey(0)
    k_param, k_x = jax.random.split(key)
    B, L, C = 2, 8, 64
    adaptor = VarianceAdaptorPallas(k_param, input_channels=C, n_bins=32, encoder_hidden=C)
    x = jax.random.normal(k_x, (B, L, C), jnp.float32)
    outs = adaptor(x)
    outs = jax.block_until_ready(outs)
    out, log_pitch, log_energy, log_dur, mel_pos = outs
    Lmel = out.shape[1]
    assert out.shape == (B, Lmel, C)
    assert log_pitch.shape == (B, Lmel) and log_energy.shape == (B, Lmel)
    assert log_dur.shape == (B, L)
    assert mel_pos.shape == (B, Lmel)
    assert bool(jnp.all(jnp.isfinite(out)))
    assert bool(jnp.all(jnp.isfinite(log_pitch))) and bool(jnp.all(jnp.isfinite(log_energy)))
    print("KERNEL_OK")
</pallas_src>

<mosaic_0001>
module attributes {stable_mosaic.version = 11 : i64} {
  func.func @kernel(%arg0: i32, %arg1: memref<16x64xf32, #tpu.memory_space<vmem>>, %arg2: memref<192x64xf32, #tpu.memory_space<vmem>>, %arg3: memref<192x64xf32, #tpu.memory_space<vmem>>, %arg4: memref<8x64xf32, #tpu.memory_space<vmem>>, %arg5: memref<16x1xf32, #tpu.memory_space<vmem>>) attributes {dimension_semantics = [#tpu.dimension_semantics<parallel>], iteration_bounds = array<i64: 1>, scalar_prefetch = 0 : i64, scratch_operands = 0 : i64, tpu.core_type = #tpu.core_type<tc>, window_params = [{transform_indices = @transform_0, window_bounds = array<i64: 16, 64>}, {pipeline_mode = #tpu.pipeline_mode<synchronous>, transform_indices = @transform_1, window_bounds = array<i64: 192, 64>}, {pipeline_mode = #tpu.pipeline_mode<synchronous>, transform_indices = @transform_2, window_bounds = array<i64: 192, 64>}, {pipeline_mode = #tpu.pipeline_mode<synchronous>, transform_indices = @transform_3, window_bounds = array<i64: 8, 64>}, {transform_indices = @transform_4, window_bounds = array<i64: 16, 1>}]} {
    %c0 = arith.constant 0 : index
    %c0_0 = arith.constant 0 : index
    %0 = vector.load %arg1[%c0, %c0_0] : memref<16x64xf32, #tpu.memory_space<vmem>>, vector<16x64xf32>
    %c0_1 = arith.constant 0 : index
    %c0_2 = arith.constant 0 : index
    %1 = vector.load %arg4[%c0_1, %c0_2] : memref<8x64xf32, #tpu.memory_space<vmem>>, vector<8x64xf32>
    %2 = vector.extract_strided_slice %1 {offsets = [0, 0], sizes = [1, 64], strides = [1, 1]} : vector<8x64xf32> to vector<1x64xf32>
    %3 = vector.extract_strided_slice %1 {offsets = [1, 0], sizes = [1, 64], strides = [1, 1]} : vector<8x64xf32> to vector<1x64xf32>
    %4 = vector.extract_strided_slice %1 {offsets = [2, 0], sizes = [1, 64], strides = [1, 1]} : vector<8x64xf32> to vector<1x64xf32>
    %5 = vector.extract_strided_slice %1 {offsets = [3, 0], sizes = [1, 64], strides = [1, 1]} : vector<8x64xf32> to vector<1x64xf32>
    %6 = vector.extract_strided_slice %1 {offsets = [4, 0], sizes = [1, 64], strides = [1, 1]} : vector<8x64xf32> to vector<1x64xf32>
    %7 = vector.extract_strided_slice %1 {offsets = [5, 0], sizes = [1, 64], strides = [1, 1]} : vector<8x64xf32> to vector<1x64xf32>
    %8 = vector.extract_strided_slice %1 {offsets = [6, 0], sizes = [1, 64], strides = [1, 1]} : vector<8x64xf32> to vector<1x64xf32>
    %9 = vector.extract_strided_slice %1 {offsets = [7, 0], sizes = [1, 64], strides = [1, 1]} : vector<8x64xf32> to vector<1x64xf32>
    %10 = tpu.iota {dimensions = array<i32: 0>} : vector<16x1xi32>
    %c7_i32 = arith.constant 7 : i32
    %11 = vector.broadcast %c7_i32 : i32 to vector<16x1xi32>
    %12 = arith.andi %10, %11 : vector<16x1xi32>
    %c0_i32 = arith.constant 0 : i32
    %13 = vector.broadcast %c0_i32 : i32 to vector<16x1xi32>
    %14 = arith.cmpi ne, %12, %13 : vector<16x1xi32>
    %15 = arith.extui %14 : vector<16x1xi1> to vector<16x1xi32>
    %16 = arith.sitofp %15 : vector<16x1xi32> to vector<16x1xf32>
    %c7_i32_3 = arith.constant 7 : i32
    %17 = vector.broadcast %c7_i32_3 : i32 to vector<16x1xi32>
    %18 = arith.cmpi ne, %12, %17 : vector<16x1xi32>
    %19 = arith.extui %18 : vector<16x1xi1> to vector<16x1xi32>
    %20 = arith.sitofp %19 : vector<16x1xi32> to vector<16x1xf32>
    %cst = arith.constant 0.000000e+00 : f32
    %21 = vector.broadcast %cst : f32 to vector<1x64xf32>
    %22 = vector.extract_strided_slice %0 {offsets = [0, 0], sizes = [15, 64], strides = [1, 1]} : vector<16x64xf32> to vector<15x64xf32>
    %23 = tpu.concatenate %21, %22 in 0 : vector<1x64xf32>, vector<15x64xf32> -> vector<16x64xf32>
    %24 = vector.broadcast %16 : vector<16x1xf32> to vector<16x64xf32>
    %25 = arith.mulf %23, %24 : vector<16x64xf32>
    %26 = vector.extract_strided_slice %0 {offsets = [1, 0], sizes = [15, 64], strides = [1, 1]} : vector<16x64xf32> to vector<15x64xf32>
    %27 = tpu.concatenate %26, %21 in 0 : vector<15x64xf32>, vector<1x64xf32> -> vector<16x64xf32>
    %28 = vector.broadcast %20 : vector<16x1xf32> to vector<16x64xf32>
    %29 = arith.mulf %27, %28 : vector<16x64xf32>
    %30 = tpu.concatenate %25, %0, %29 in 1 : vector<16x64xf32>, vector<16x64xf32>, vector<16x64xf32> -> vector<16x192xf32>
    %c0_4 = arith.constant 0 : index
    %c0_5 = arith.constant 0 : index
    %31 = vector.load %arg2[%c0_4, %c0_5] : memref<192x64xf32, #tpu.memory_space<vmem>>, vector<192x64xf32>
    %cst_6 = arith.constant dense<0.000000e+00> : vector<16x64xf32>
    %32 = tpu.matmul %30, %31, %cst_6 {dimension_numbers = #tpu.dot_dimension_numbers<[1], [0], [0], [1], [0, 0, 1, 1], [], []>} : vector<16x192xf32>, vector<192x64xf32>, vector<16x64xf32> -> vector<16x64xf32>
    %33 = vector.broadcast %2 : vector<1x64xf32> to vector<16x64xf32>
    %34 = arith.addf %32, %33 : vector<16x64xf32>
    %cst_7 = arith.constant 0.000000e+00 : f32
    %35 = vector.broadcast %cst_7 : f32 to vector<16x64xf32>
    %36 = arith.maximumf %34, %35 : vector<16x64xf32>
    %cst_8 = arith.constant dense<0.000000e+00> : vector<16xf32>
    %37 = vector.multi_reduction <add>, %36, %cst_8 [1] : vector<16x64xf32> to vector<16xf32>
    %38 = vector.shape_cast %37 : vector<16xf32> to vector<16x1xf32>
    %cst_9 = arith.constant 6.400000e+01 : f32
    %39 = vector.broadcast %cst_9 : f32 to vector<16x1xf32>
    %40 = arith.divf %38, %39 : vector<16x1xf32>
    %41 = vector.broadcast %40 : vector<16x1xf32> to vector<16x64xf32>
    %42 = arith.subf %36, %41 : vector<16x64xf32>
    %43 = arith.mulf %42, %42 : vector<16x64xf32>
    %cst_10 = arith.constant dense<0.000000e+00> : vector<16xf32>
    %44 = vector.multi_reduction <add>, %43, %cst_10 [1] : vector<16x64xf32> to vector<16xf32>
    %45 = vector.shape_cast %44 : vector<16xf32> to vector<16x1xf32>
    %cst_11 = arith.constant 6.400000e+01 : f32
    %46 = vector.broadcast %cst_11 : f32 to vector<16x1xf32>
    %47 = arith.divf %45, %46 : vector<16x1xf32>
    %48 = vector.broadcast %40 : vector<16x1xf32> to vector<16x64xf32>
    %49 = arith.subf %36, %48 : vector<16x64xf32>
    %cst_12 = arith.constant 9.99999974E-6 : f32
    %50 = vector.broadcast %cst_12 : f32 to vector<16x1xf32>
    %51 = arith.addf %47, %50 : vector<16x1xf32>
    %52 = math.rsqrt %51 : vector<16x1xf32>
    %53 = vector.broadcast %52 : vector<16x1xf32> to vector<16x64xf32>
    %54 = arith.mulf %49, %53 : vector<16x64xf32>
    %55 = vector.broadcast %3 : vector<1x64xf32> to vector<16x64xf32>
    %56 = arith.mulf %54, %55 : vector<16x64xf32>
    %57 = vector.broadcast %4 : vector<1x64xf32> to vector<16x64xf32>
    %58 = arith.addf %56, %57 : vector<16x64xf32>
    %cst_13 = arith.constant 0.000000e+00 : f32
    %59 = vector.broadcast %cst_13 : f32 to vector<1x64xf32>
    %60 = vector.extract_strided_slice %58 {offsets = [0, 0], sizes = [15, 64], strides = [1, 1]} : vector<16x64xf32> to vector<15x64xf32>
    %61 = tpu.concatenate %59, %60 in 0 : vector<1x64xf32>, vector<15x64xf32> -> vector<16x64xf32>
    %62 = vector.broadcast %16 : vector<16x1xf32> to vector<16x64xf32>
    %63 = arith.mulf %61, %62 : vector<16x64xf32>
    %64 = vector.extract_strided_slice %58 {offsets = [1, 0], sizes = [15, 64], strides = [1, 1]} : vector<16x64xf32> to vector<15x64xf32>
    %65 = tpu.concatenate %64, %59 in 0 : vector<15x64xf32>, vector<1x64xf32> -> vector<16x64xf32>
    %66 = vector.broadcast %20 : vector<16x1xf32> to vector<16x64xf32>
    %67 = arith.mulf %65, %66 : vector<16x64xf32>
    %68 = tpu.concatenate %63, %58, %67 in 1 : vector<16x64xf32>, vector<16x64xf32>, vector<16x64xf32> -> vector<16x192xf32>
    %c0_14 = arith.constant 0 : index
    %c0_15 = arith.constant 0 : index
    %69 = vector.load %arg3[%c0_14, %c0_15] : memref<192x64xf32, #tpu.memory_space<vmem>>, vector<192x64xf32>
    %cst_16 = arith.constant dense<0.000000e+00> : vector<16x64xf32>
    %70 = tpu.matmul %68, %69, %cst_16 {dimension_numbers = #tpu.dot_dimension_numbers<[1], [0], [0], [1], [0, 0, 1, 1], [], []>} : vector<16x192xf32>, vector<192x64xf32>, vector<16x64xf32> -> vector<16x64xf32>
    %71 = vector.broadcast %5 : vector<1x64xf32> to vector<16x64xf32>
    %72 = arith.addf %70, %71 : vector<16x64xf32>
    %cst_17 = arith.constant 0.000000e+00 : f32
    %73 = vector.broadcast %cst_17 : f32 to vector<16x64xf32>
    %74 = arith.maximumf %72, %73 : vector<16x64xf32>
    %cst_18 = arith.constant dense<0.000000e+00> : vector<16xf32>
    %75 = vector.multi_reduction <add>, %74, %cst_18 [1] : vector<16x64xf32> to vector<16xf32>
    %76 = vector.shape_cast %75 : vector<16xf32> to vector<16x1xf32>
    %cst_19 = arith.constant 6.400000e+01 : f32
    %77 = vector.broadcast %cst_19 : f32 to vector<16x1xf32>
    %78 = arith.divf %76, %77 : vector<16x1xf32>
    %79 = vector.broadcast %78 : vector<16x1xf32> to vector<16x64xf32>
    %80 = arith.subf %74, %79 : vector<16x64xf32>
    %81 = arith.mulf %80, %80 : vector<16x64xf32>
    %cst_20 = arith.constant dense<0.000000e+00> : vector<16xf32>
    %82 = vector.multi_reduction <add>, %81, %cst_20 [1] : vector<16x64xf32> to vector<16xf32>
    %83 = vector.shape_cast %82 : vector<16xf32> to vector<16x1xf32>
    %cst_21 = arith.constant 6.400000e+01 : f32
    %84 = vector.broadcast %cst_21 : f32 to vector<16x1xf32>
    %85 = arith.divf %83, %84 : vector<16x1xf32>
    %86 = vector.broadcast %78 : vector<16x1xf32> to vector<16x64xf32>
    %87 = arith.subf %74, %86 : vector<16x64xf32>
    %cst_22 = arith.constant 9.99999974E-6 : f32
    %88 = vector.broadcast %cst_22 : f32 to vector<16x1xf32>
    %89 = arith.addf %85, %88 : vector<16x1xf32>
    %90 = math.rsqrt %89 : vector<16x1xf32>
    %91 = vector.broadcast %90 : vector<16x1xf32> to vector<16x64xf32>
    %92 = arith.mulf %87, %91 : vector<16x64xf32>
    %93 = vector.broadcast %6 : vector<1x64xf32> to vector<16x64xf32>
    %94 = arith.mulf %92, %93 : vector<16x64xf32>
    %95 = vector.broadcast %7 : vector<1x64xf32> to vector<16x64xf32>
    %96 = arith.addf %94, %95 : vector<16x64xf32>
    %97 = vector.broadcast %8 : vector<1x64xf32> to vector<16x64xf32>
    %98 = arith.mulf %96, %97 : vector<16x64xf32>
    %99 = vector.broadcast %9 : vector<1x64xf32> to vector<16x64xf32>
    %100 = arith.addf %98, %99 : vector<16x64xf32>
    %cst_23 = arith.constant dense<0.000000e+00> : vector<16xf32>
    %101 = vector.multi_reduction <add>, %100, %cst_23 [1] : vector<16x64xf32> to vector<16xf32>
    %102 = vector.shape_cast %101 : vector<16xf32> to vector<16x1xf32>
    %cst_24 = arith.constant 0.000000e+00 : f32
    %103 = vector.broadcast %cst_24 : f32 to vector<16x1xf32>
    %104 = arith.maximumf %102, %103 : vector<16x1xf32>
    %c0_25 = arith.constant 0 : index
    %c0_26 = arith.constant 0 : index
    %105 = vector.load %arg5[%c0_25, %c0_26] : memref<16x1xf32, #tpu.memory_space<vmem>>, vector<16x1xf32>
    tpu.vector_store %arg5[%c0_25, %c0_26], %104 {strides = array<i32>} : memref<16x1xf32, #tpu.memory_space<vmem>>, vector<16x1xf32>,
    return
  }
  func.func @transform_0(%arg0: i32) -> (i32, i32) {
    %c0_i32 = arith.constant 0 : i32
    %c0_i32_0 = arith.constant 0 : i32
    return %arg0, %c0_i32 : i32, i32
  }
  func.func @transform_1(%arg0: i32) -> (i32, i32) {
    %c0_i32 = arith.constant 0 : i32
    %c0_i32_0 = arith.constant 0 : i32
    %c0_i32_1 = arith.constant 0 : i32
    return %c0_i32, %c0_i32_0 : i32, i32
  }
  func.func @transform_2(%arg0: i32) -> (i32, i32) {
    %c0_i32 = arith.constant 0 : i32
    %c0_i32_0 = arith.constant 0 : i32
    %c0_i32_1 = arith.constant 0 : i32
    return %c0_i32, %c0_i32_0 : i32, i32
  }
  func.func @transform_3(%arg0: i32) -> (i32, i32) {
    %c0_i32 = arith.constant 0 : i32
    %c0_i32_0 = arith.constant 0 : i32
    %c0_i32_1 = arith.constant 0 : i32
    return %c0_i32, %c0_i32_0 : i32, i32
  }
  func.func @transform_4(%arg0: i32) -> (i32, i32) {
    %c0_i32 = arith.constant 0 : i32
    %c0_i32_0 = arith.constant 0 : i32
    return %arg0, %c0_i32 : i32, i32
  }
}

</mosaic_0001>

<bundles_post_ra>
// kernel: tpu_custom_call.1
= control target key start
LH: loop header
LB: loop body
LE: loop exit
PB: predicated region body
PF: predicated region fallthrough
CT: control target
= control target key end

     0   :  { %v20_v0 = vlaneseq  ;;  %v509_v3 = vmov 0.0|0.0   ;;  %s510_s21 = smov 64   ;;  %vm48_vm0 = vcmask 1046528   ;;  %vm39_vm1 = vcmask 1040384   ;;  %s823_s0 = inlined_call_operand.vmem [shape: f32[16,64], index: 0, kind: input, shape index: {}]   ;;  %s824_s1 = inlined_call_operand.vmem [shape: f32[192,64], index: 1, kind: input, shape index: {}]   ;;  %s825_s3 = inlined_call_operand.vmem [shape: f32[8,64], index: 3, kind: input, shape index: {}]   ;;  %s826_s2 = inlined_call_operand.vmem [shape: f32[192,64], index: 2, kind: input, shape index: {}]   ;;  %s827_s4 = inlined_call_operand.vmem [shape: f32[16,1], index: 4, kind: output, shape index: {}]  }
   0x1   :  { %v540_v1 = vld [vmem:[%s823_s0] sm:$0xff]  ;;  %v545_v2 = vld [vmem:[%s823_s0 + $0x8] sm:$0xff]  ;;  %426 = vmatprep.subr.bf16.mxu0 %v509_v3  ;;  %462 = vmatprep.subr.bf16.mxu1 %v509_v3  ;;  %v68_v9 = vld [vmem:[%s824_s1 + $0x10] sm:$0xff]  ;;  %v511_v20 = vmov 0.0   ;;  %vm63_vm4 = vcmask 523264   ;;  %vm411_vm7 = vcmask 7168  }
   0x2   :  { %v66_v4 = vld [vmem:[%s824_s1] sm:$0xff]  ;;  %57 = vrot.lane.b32.xlu0 %v540_v1, %s510_s21  ;;  %v49_v5 = vrot.slane %v540_v1, 1  ;;  %v41_v6 = vrot.slane %v545_v2, 7  ;;  %v50_v7 = vrot.slane %v545_v2, 1  ;;  %v67_v8 = vld [vmem:[%s824_s1 + $0x8] sm:$0xff]  ;;  %v69_v11 = vld [vmem:[%s824_s1 + $0x18] sm:$0xff] }
   0x3   :  { %v427_v10 = vpack.c.bf16 %v67_v8, %v66_v4  ;;  %v566_v12 = vshrl.u32 %v20_v0, 7  ;;  %v40_v13 = vrot.slane %v540_v1, 7  ;;  %v430_v14 = vpack.c.bf16 %v69_v11, %v68_v9  ;;  %v70_v16 = vld [vmem:[%s824_s1 + $0x20] sm:$0xff]  ;;  %v71_v17 = vld [vmem:[%s824_s1 + $0x28] sm:$0xff]  ;;  %v72_v25 = vld [vmem:[%s824_s1 + $0x30] sm:$0xff] }
   0x4   :  { %v51_v18 = vsel %vm48_vm0, %v49_v5, %v50_v7  ;;  %v433_v23 = vpack.c.bf16 %v71_v17, %v70_v16  ;;  %v73_v26 = vld [vmem:[%s824_s1 + $0x38] sm:$0xff]  ;;  %v74_v28 = vld [vmem:[%s824_s1 + $0x40] sm:$0xff]  ;;  %v75_v29 = vld [vmem:[%s824_s1 + $0x48] sm:$0xff]  ;;  %v54_v55 = vsel %vm48_vm0, %v50_v7, 0.0 }
   0x5   :  { %428 = vmatpush1.bf16.msra.mxu0 %v427_v10  ;;  %v23_v15 = vand.u32 7, %v566_v12  ;;  %v585_v19 = vsel %vm39_vm1, %v40_v13, %v41_v6  ;;  %v436_v27 = vpack.c.bf16 %v73_v26, %v72_v25  ;;  %v439_v30 = vpack.c.bf16 %v75_v29, %v74_v28  ;;  %v76_v31 = vld [vmem:[%s824_s1 + $0x50] sm:$0xff]  ;;  %v77_v32 = vld [vmem:[%s824_s1 + $0x58] sm:$0xff]  ;;  %v78_v34 = vld [vmem:[%s824_s1 + $0x60] sm:$0xff] }
   0x6   :  { %59 = vrot.lane.b32.xlu0 %v545_v2, %s510_s21  ;;  %429 = vmatprep.subr.bf16.mxu0 %v509_v3  ;;  %v442_v33 = vpack.c.bf16 %v77_v32, %v76_v31  ;;  %v79_v35 = vld [vmem:[%s824_s1 + $0x68] sm:$0xff]  ;;  %v80_v37 = vld [vmem:[%s824_s1 + $0x70] sm:$0xff]  ;;  %v81_v38 = vld [vmem:[%s824_s1 + $0x78] sm:$0xff]  ;;  %v22_v52 = vadd.s32 8, %v566_v12  ;;  %v45_v54 = vsel %vm39_vm1, 0.0, %v40_v13  ;;  %v92_v1 = vsub.s32 0, %v566_v12 }
   0x7   :  { %vm25_vm2 = vcmp.ne.s32.totalorder %v23_v15, 0  ;;  %vm31_vm3 = vcmp.ne.s32.totalorder %v23_v15, 7  ;;  %v445_v36 = vpack.c.bf16 %v79_v35, %v78_v34  ;;  %v448_v39 = vpack.c.bf16 %v81_v38, %v80_v37  ;;  %v82_v40 = vld [vmem:[%s824_s1 + $0x80] sm:$0xff]  ;;  %v83_v41 = vld [vmem:[%s824_s1 + $0x88] sm:$0xff]  ;;  %v84_v43 = vld [vmem:[%s824_s1 + $0x90] sm:$0xff] }
   0x8   :  { %v588_v21 = vsel %vm31_vm3, 1.0, %v511_v20  ;;  %v591_v22 = vsel %vm25_vm2, 1.0, %v511_v20  ;;  %v451_v42 = vpack.c.bf16 %v83_v41, %v82_v40  ;;  %v85_v44 = vld [vmem:[%s824_s1 + $0x98] sm:$0xff]  ;;  %v86_v46 = vld [vmem:[%s824_s1 + $0xa0] sm:$0xff]  ;;  %v87_v47 = vld [vmem:[%s824_s1 + $0xa8] sm:$0xff]  ;;  %v24_v53 = vand.u32 7, %v22_v52 }
   0x9   :  { %431 = vmatpush1.bf16.msra.mxu0 %v430_v14  ;;  %v55_v24 = vmul.f32 %v588_v21, %v51_v18  ;;  %v454_v45 = vpack.c.bf16 %v85_v44, %v84_v43  ;;  %v457_v48 = vpack.c.bf16 %v87_v47, %v86_v46  ;;  %v88_v49 = vld [vmem:[%s824_s1 + $0xb0] sm:$0xff]  ;;  %v89_v50 = vld [vmem:[%s824_s1 + $0xb8] sm:$0xff]  ;;  %v46_v57 = vmul.f32 %v591_v22, %v45_v54  ;;  %v683_v2 = vld [vmem:[%s825_s3] sm:$0xff] }
   0xa   :  { %432 = vmatprep.subr.bf16.mxu0 %v509_v3  ;;  %v460_v51 = vpack.c.bf16 %v89_v50, %v88_v49  ;;  %vm32_vm5 = vcmp.ne.s32.totalorder %v24_v53, 7  ;;  %vm26_vm6 = vcmp.ne.s32.totalorder %v24_v53, 0  ;;  %v93_v4 = vrot.slane %v683_v2, %v92_v1  ;;  %v242_v28 = vld [vmem:[%s826_s2] sm:$0xff]  ;;  %v243_v29 = vld [vmem:[%s826_s2 + $0x8] sm:$0xff]  ;;  %v245_v32 = vld [vmem:[%s826_s2 + $0x18] sm:$0xff] }
   0xb   :  { %422 = vmatprep.mubr.msk.f32.mxu0 %vm63_vm4, %v55_v24  ;;  %v667_v56 = vsel %vm32_vm5, 1.0, %v511_v20  ;;  %v671_v58 = vsel %vm26_vm6, 1.0, %v511_v20  ;;  %v463_v31 = vpack.c.bf16 %v243_v29, %v242_v28  ;;  %v246_v34 = vld [vmem:[%s826_s2 + $0x20] sm:$0xff]  ;;  %v247_v35 = vld [vmem:[%s826_s2 + $0x28] sm:$0xff]  ;;  %v248_v37 = vld [vmem:[%s826_s2 + $0x30] sm:$0xff] }
   0xc   :  { %v56_v59 = vmul.f32 %v667_v56, %v54_v55  ;;  %v47_v62 = vmul.f32 %v671_v58, %v585_v19  ;;  %v249_v38 = vld [vmem:[%s826_s2 + $0x38] sm:$0xff]  ;;  %v250_v40 = vld [vmem:[%s826_s2 + $0x40] sm:$0xff]  ;;  %v251_v41 = vld [vmem:[%s826_s2 + $0x48] sm:$0xff] }
   0xd   :  { %434 = vmatpush1.bf16.msra.mxu0 %v433_v23  ;;  %464 = vmatpush1.bf16.msra.mxu1 %v463_v31  ;;  %v252_v43 = vld [vmem:[%s826_s2 + $0x50] sm:$0xff]  ;;  %v253_v44 = vld [vmem:[%s826_s2 + $0x58] sm:$0xff]  ;;  %v254_v46 = vld [vmem:[%s826_s2 + $0x60] sm:$0xff] }
   0xe   :  { %435 = vmatprep.subr.bf16.mxu0 %v509_v3  ;;  %465 = vmatprep.subr.bf16.mxu1 %v509_v3  ;;  %v255_v47 = vld [vmem:[%s826_s2 + $0x68] sm:$0xff]  ;;  %v256_v49 = vld [vmem:[%s826_s2 + $0x70] sm:$0xff]  ;;  %v257_v50 = vld [vmem:[%s826_s2 + $0x78] sm:$0xff] }
   0xf   :  { %v258_v52 = vld [vmem:[%s826_s2 + $0x80] sm:$0xff]  ;;  %v259_v53 = vld [vmem:[%s826_s2 + $0x88] sm:$0xff]  ;;  %v260_v55 = vld [vmem:[%s826_s2 + $0x90] sm:$0xff] }
  0x10   :  { %v487_v54 = vpack.c.bf16 %v259_v53, %v258_v52 }
  0x11   :  { %437 = vmatpush1.bf16.msra.mxu0 %v436_v27 }
  0x12   :  { %438 = vmatprep.subr.bf16.mxu0 %v509_v3 }
  0x15   :  { %440 = vmatpush1.bf16.msra.mxu0 %v439_v30  ;;  %v244_v30 = vld [vmem:[%s826_s2 + $0x10] sm:$0xff] }
  0x16   :  { %441 = vmatprep.subr.bf16.mxu0 %v509_v3 }
  0x19   :  { %443 = vmatpush1.bf16.msra.mxu0 %v442_v33  ;;  %v466_v33 = vpack.c.bf16 %v245_v32, %v244_v30 }
  0x1a   :  { %444 = vmatprep.subr.bf16.mxu0 %v509_v3 }
  0x1b   :  { %467 = vmatpush1.bf16.msra.mxu1 %v466_v33 }
  0x1c   :  { %468 = vmatprep.subr.bf16.mxu1 %v509_v3 }
  0x1d   :  { %446 = vmatpush1.bf16.msra.mxu0 %v445_v36  ;;  %v469_v36 = vpack.c.bf16 %v247_v35, %v246_v34 }
  0x1e   :  { %447 = vmatprep.subr.bf16.mxu0 %v509_v3 }
  0x1f   :  { %470 = vmatpush1.bf16.msra.mxu1 %v469_v36 }
  0x20   :  { %471 = vmatprep.subr.bf16.mxu1 %v509_v3 }
  0x21   :  { %449 = vmatpush1.bf16.msra.mxu0 %v448_v39  ;;  %v472_v39 = vpack.c.bf16 %v249_v38, %v248_v37 }
  0x22   :  { %450 = vmatprep.subr.bf16.mxu0 %v509_v3 }
  0x23   :  { %473 = vmatpush1.bf16.msra.mxu1 %v472_v39  ;;  %v268_v39 = vsub.s32 3, %v566_v12 }
  0x24   :  { %474 = vmatprep.subr.bf16.mxu1 %v509_v3 }
  0x25   :  { %452 = vmatpush1.bf16.msra.mxu0 %v451_v42  ;;  %v475_v42 = vpack.c.bf16 %v251_v41, %v250_v40  ;;  %v269_v40 = vrot.slane %v683_v2, %v268_v39 }
  0x26   :  { %453 = vmatprep.subr.bf16.mxu0 %v509_v3 }
  0x27   :  { %476 = vmatpush1.bf16.msra.mxu1 %v475_v42 }
  0x28   :  { %477 = vmatprep.subr.bf16.mxu1 %v509_v3 }
  0x29   :  { %455 = vmatpush1.bf16.msra.mxu0 %v454_v45  ;;  %v478_v45 = vpack.c.bf16 %v253_v44, %v252_v43 }
  0x2a   :  { %456 = vmatprep.subr.bf16.mxu0 %v509_v3 }
  0x2b   :  { %479 = vmatpush1.bf16.msra.mxu1 %v478_v45 }
  0x2c   :  { %480 = vmatprep.subr.bf16.mxu1 %v509_v3 }
  0x2d   :  { %458 = vmatpush1.bf16.msra.mxu0 %v457_v48  ;;  %v481_v48 = vpack.c.bf16 %v255_v47, %v254_v46 }
  0x2e   :  { %459 = vmatprep.subr.bf16.mxu0 %v509_v3 }
  0x2f   :  { %482 = vmatpush1.bf16.msra.mxu1 %v481_v48 }
  0x30   :  { %483 = vmatprep.subr.bf16.mxu1 %v509_v3 }
  0x31   :  { %461 = vmatpush1.bf16.msra.mxu0 %v460_v51  ;;  %v484_v51 = vpack.c.bf16 %v257_v50, %v256_v49 }
  0x33   :  { %485 = vmatpush1.bf16.msra.mxu1 %v484_v51 }
  0x34   :  { %486 = vmatprep.subr.bf16.mxu1 %v509_v3 }
  0x37   :  { %488 = vmatpush1.bf16.msra.mxu1 %v487_v54 }
  0x38   :  { %489 = vmatprep.subr.bf16.mxu1 %v509_v3 }
  0x74   :  { %v58_v60 = vpop.permute.xlu0 %57 }
  0x75   :  { %v64_v61 = vsel %vm63_vm4, %v46_v57, %v58_v60  ;;  %v261_v57 = vld [vmem:[%s826_s2 + $0x98] sm:$0xff]  ;;  %v262_v60 = vld [vmem:[%s826_s2 + $0xa0] sm:$0xff] }
  0x76   :  { %165 = vmatmul.mubr.f32.vlgmr.msra.gmra.mrb[0].mxu0 %v64_v61  ;;  %v263_v61 = vld [vmem:[%s826_s2 + $0xa8] sm:$0xff] }
  0x77   :  { %423 = vmatprep.mubr.msk.f32.mxu0 %vm63_vm4, %v56_v59  ;;  %v490_v59 = vpack.c.bf16 %v261_v57, %v260_v55 }
  0x78   :  { %v60_v63 = vpop.permute.xlu0 %59 }
  0x79   :  { %v65_v0 = vsel %vm63_vm4, %v47_v62, %v60_v63  ;;  %491 = vmatpush1.bf16.msra.mxu1 %v490_v59  ;;  %v493_v62 = vpack.c.bf16 %v263_v61, %v262_v60  ;;  %v264_v63 = vld [vmem:[%s826_s2 + $0xb0] sm:$0xff] }
  0x7a   :  { %170 = vmatmul.mubr.f32.gmra.mrb[2].mxu0 %v65_v0  ;;  %492 = vmatprep.subr.bf16.mxu1 %v509_v3  ;;  %v265_v0 = vld [vmem:[%s826_s2 + $0xb8] sm:$0xff] }
  0x7b   :  { %v496_v1 = vpack.c.bf16 %v265_v0, %v264_v63 }
  0x7d   :  { %494 = vmatpush1.bf16.msra.mxu1 %v493_v62 }
  0x7e   :  { %495 = vmatprep.subr.bf16.mxu1 %v509_v3 }
  0x81   :  { %497 = vmatpush1.bf16.msra.mxu1 %v496_v1 }
 0x149   :  { %v166_v5 = vpop.f32.mrb[0].mxu0 }
 0x14a   :  { %v167_v6 = vadd.f32 %v166_v5, %v93_v4  ;;  %v168_v7 = vpop.f32.mrb[1].mxu0 }
 0x14c   :  { %v175_v8 = vmax.f32 %v167_v6, 0.0 }
 0x14d   :  { %v171_v9 = vpop.f32.mrb[2].mxu0 }
 0x14e   :  { %v172_v10 = vadd.f32 %v171_v9, %v93_v4  ;;  %v173_v11 = vpop.f32.mrb[3].mxu0  ;;  %v177_v13 = vsel %vm63_vm4, %v175_v8, 0.0 }
 0x14f   :  { %178 = vadd.xlane.f32.xlu1 %v177_v13  ;;  %v212_v11 = vsub.s32 2, %v566_v12 }
 0x150   :  { %v176_v14 = vmax.f32 %v172_v10, 0.0  ;;  %v206_v10 = vsub.s32 1, %v566_v12 }
 0x151   :  { %v213_v3 = vrot.slane %v683_v2, %v212_v11  ;;  %v399_v11 = vsub.s32 7, %v566_v12 }
 0x152   :  { %v180_v15 = vsel %vm63_vm4, %v176_v14, 0.0  ;;  %v207_v13 = vrot.slane %v683_v2, %v206_v10 }
 0x153   :  { %181 = vadd.xlane.f32.xlu1 %v180_v15 }
 0x1dc   :  { %v179_v16 = vpop.xlane.xlu1 %178 }
 0x1dd   :  { %v184_v17 = vmul.f32 0.015625, %v179_v16 }
 0x1df   :  { %v688_v18 = vsub.f32 %v175_v8, %v184_v17 }
 0x1e0   :  { %v182_v19 = vpop.xlane.xlu1 %181 }
 0x1e1   :  { %v185_v20 = vmul.f32 0.015625, %v182_v19  ;;  %v188_v23 = vmul.f32 %v688_v18, %v688_v18 }
 0x1e3   :  { %v692_v24 = vsub.f32 %v176_v14, %v185_v20  ;;  %v190_v25 = vsel %vm63_vm4, %v188_v23, 0.0 }
 0x1e4   :  { %191 = vadd.xlane.f32.xlu0 %v190_v25 }
 0x1e5   :  { %v189_v26 = vmul.f32 %v692_v24, %v692_v24 }
 0x1e7   :  { %v193_v27 = vsel %vm63_vm4, %v189_v26, 0.0 }
 0x1e8   :  { %194 = vadd.xlane.f32.xlu1 %v193_v27 }
 0x271   :  { %v192_v4 = vpop.xlane.xlu0 %191 }
 0x272   :  { %v196_v5 = vmul.f32 0.015625, %v192_v4  ;;  %v381_v4 = vsub.s32 4, %v566_v12 }
 0x274   :  { %v198_v6 = vadd.f32 1e-05, %v196_v5  ;;  %v387_v5 = vsub.s32 5, %v566_v12 }
 0x275   :  { %v195_v7 = vpop.xlane.xlu1 %194 }
 0x276   :  { %501 = vrsqrt.f32 %v198_v6  ;;  %v197_v8 = vmul.f32 0.015625, %v195_v7  ;;  %v382_v6 = vrot.slane %v683_v2, %v381_v4  ;;  %v393_v7 = vsub.s32 6, %v566_v12 }
 0x277   :  { %v388_v10 = vrot.slane %v683_v2, %v387_v5 }
 0x278   :  { %v199_v9 = vadd.f32 1e-05, %v197_v8 }
 0x27a   :  { %503 = vrsqrt.f32 %v199_v9 }
 0x280   :  { %v502_v14 = vpop.eup %501 }
 0x281   :  { %v202_v15 = vmul.f32 %v502_v14, %v688_v18  ;;  %v394_v14 = vrot.slane %v683_v2, %v393_v7 }
 0x283   :  { %v208_v16 = vmul.f32 %v207_v13, %v202_v15 }
 0x284   :  { %v504_v17 = vpop.eup %503 }
 0x285   :  { %v214_v19 = vadd.f32 %v213_v3, %v208_v16  ;;  %v203_v20 = vmul.f32 %v504_v17, %v692_v24  ;;  %v400_v16 = vrot.slane %v683_v2, %v399_v11 }
 0x287   :  { %234 = vrot.lane.b32.xlu1 %v214_v19, %s510_s21  ;;  %v209_v23 = vmul.f32 %v207_v13, %v203_v20  ;;  %v218_v26 = vrot.slane %v214_v19, 7  ;;  %v226_v28 = vrot.slane %v214_v19, 1 }
 0x289   :  { %v215_v25 = vadd.f32 %v213_v3, %v209_v23  ;;  %v223_v24 = vsel %vm39_vm1, 0.0, %v218_v26 }
 0x28a   :  { %v224_v33 = vmul.f32 %v591_v22, %v223_v24 }
 0x28b   :  { %236 = vrot.lane.b32.xlu1 %v215_v25, %s510_s21  ;;  %v219_v27 = vrot.slane %v215_v25, 7  ;;  %v227_v29 = vrot.slane %v215_v25, 1 }
 0x28d   :  { %v228_v30 = vsel %vm48_vm0, %v226_v28, %v227_v29  ;;  %v220_v18 = vsel %vm39_vm1, %v218_v26, %v219_v27  ;;  %v231_v32 = vsel %vm48_vm0, %v227_v29, 0.0 }
 0x28e   :  { %v232_v31 = vmul.f32 %v588_v21, %v228_v30  ;;  %v233_v36 = vmul.f32 %v667_v56, %v231_v32  ;;  %v225_v37 = vmul.f32 %v671_v58, %v220_v18 }
 0x290   :  { %424 = vmatprep.mubr.msk.f32.mxu1 %vm63_vm4, %v232_v31 }
 0x2f9   :  { %v235_v34 = vpop.permute.xlu1 %234 }
 0x2fa   :  { %v240_v35 = vsel %vm63_vm4, %v224_v33, %v235_v34 }
 0x2fb   :  { %341 = vmatmul.mubr.f32.vlgmr.msra.gmra.mrb[0].mxu1 %v240_v35 }
 0x2fc   :  { %425 = vmatprep.mubr.msk.f32.mxu1 %vm63_vm4, %v233_v36 }
 0x2fd   :  { %v237_v38 = vpop.permute.xlu1 %236 }
 0x2fe   :  { %v241_v21 = vsel %vm63_vm4, %v225_v37, %v237_v38 }
 0x2ff   :  { %346 = vmatmul.mubr.f32.gmra.mrb[2].mxu1 %v241_v21 }
 0x3ce   :  { %v342_v41 = vpop.f32.mrb[0].mxu1 }
 0x3cf   :  { %v343_v22 = vadd.f32 %v342_v41, %v269_v40  ;;  %v344_v42 = vpop.f32.mrb[1].mxu1 }
 0x3d1   :  { %v351_v43 = vmax.f32 %v343_v22, 0.0 }
 0x3d2   :  { %v347_v44 = vpop.f32.mrb[2].mxu1 }
 0x3d3   :  { %v348_v45 = vadd.f32 %v347_v44, %v269_v40  ;;  %v349_v56 = vpop.f32.mrb[3].mxu1  ;;  %v353_v46 = vsel %vm63_vm4, %v351_v43, 0.0 }
 0x3d4   :  { %354 = vadd.xlane.f32.xlu1 %v353_v46 }
 0x3d5   :  { %v352_v47 = vmax.f32 %v348_v45, 0.0 }
 0x3d7   :  { %v356_v58 = vsel %vm63_vm4, %v352_v47, 0.0 }
 0x3d8   :  { %357 = vadd.xlane.f32.xlu0 %v356_v58 }
 0x461   :  { %v355_v48 = vpop.xlane.xlu1 %354 }
 0x462   :  { %v359_v49 = vmul.f32 0.015625, %v355_v48 }
 0x464   :  { %v361_v50 = vsub.f32 %v351_v43, %v359_v49 }
 0x465   :  { %v358_v51 = vpop.xlane.xlu0 %357 }
 0x466   :  { %v360_v52 = vmul.f32 0.015625, %v358_v51  ;;  %v363_v53 = vmul.f32 %v361_v50, %v361_v50 }
 0x468   :  { %v362_v54 = vsub.f32 %v352_v47, %v360_v52  ;;  %v365_v55 = vsel %vm63_vm4, %v363_v53, 0.0 }
 0x469   :  { %366 = vadd.xlane.f32.xlu0 %v365_v55 }
 0x46a   :  { %v364_v57 = vmul.f32 %v362_v54, %v362_v54 }
 0x46c   :  { %v368_v59 = vsel %vm63_vm4, %v364_v57, 0.0 }
 0x46d   :  { %369 = vadd.xlane.f32.xlu0 %v368_v59 }
 0x4f6   :  { %v367_v60 = vpop.xlane.xlu0 %366 }
 0x4f7   :  { %v371_v61 = vmul.f32 0.015625, %v367_v60 }
 0x4f9   :  { %v373_v62 = vadd.f32 1e-05, %v371_v61 }
 0x4fa   :  { %v370_v63 = vpop.xlane.xlu0 %369 }
 0x4fb   :  { %505 = vrsqrt.f32 %v373_v62  ;;  %v372_v0 = vmul.f32 0.015625, %v370_v63 }
 0x4fd   :  { %v374_v1 = vadd.f32 1e-05, %v372_v0 }
 0x4ff   :  { %507 = vrsqrt.f32 %v374_v1 }
 0x505   :  { %v506_v8 = vpop.eup %505 }
 0x506   :  { %v377_v9 = vmul.f32 %v506_v8, %v361_v50 }
 0x508   :  { %v383_v13 = vmul.f32 %v382_v6, %v377_v9 }
 0x509   :  { %v508_v15 = vpop.eup %507 }
 0x50a   :  { %v389_v3 = vadd.f32 %v388_v10, %v383_v13  ;;  %v378_v17 = vmul.f32 %v508_v15, %v362_v54 }
 0x50c   :  { %v395_v19 = vmul.f32 %v394_v14, %v389_v3  ;;  %v384_v20 = vmul.f32 %v382_v6, %v378_v17 }
 0x50e   :  { %v401_v23 = vadd.f32 %v400_v16, %v395_v19  ;;  %v390_v25 = vadd.f32 %v388_v10, %v384_v20 }
 0x510   :  { %v403_v26 = vsel %vm63_vm4, %v401_v23, 0.0  ;;  %v396_v27 = vmul.f32 %v394_v14, %v390_v25 }
 0x511   :  { %404 = vadd.xlane.f32.xlu0 %v403_v26 }
 0x512   :  { %v402_v28 = vadd.f32 %v400_v16, %v396_v27 }
 0x514   :  { %v406_v29 = vsel %vm63_vm4, %v402_v28, 0.0 }
 0x515   :  { %407 = vadd.xlane.f32.xlu0 %v406_v29 }
 0x59e   :  { %v405_v12 = vpop.xlane.xlu0 %404 }
 0x59f   :  { %v409_v30 = vmax.f32 %v405_v12, 0.0 }
 0x5a1   :  { %412 = vst.msk [vmem:[%s827_s4] sm:$0xff] %vm411_vm7, %v409_v30 }
 0x5a2   :  { %v408_v2 = vpop.xlane.xlu0 %407 }
 0x5a3   :  { %v410_v18 = vmax.f32 %v408_v2, 0.0 }
 0x5a5   :  { %413 = vst.msk [vmem:[%s827_s4 + $0x8] sm:$0xff] %vm411_vm7, %v410_v18 }

</bundles_post_ra>
